<compile_context>
chip_gen: v6e
topology: v6e:2x2x1
jax: 0.10.0
libtpu: 0.0.40
codegen_flags: <defaults>
</compile_context>

<pallas_src>
import functools

import jax
import jax.numpy as jnp
from jax.experimental import pallas as pl
from jax.experimental.pallas import tpu as pltpu

TILE_R = 1024    # max sublane rows per grid step  -> 512 KiB f32 / 256 KiB bf16
LANES = 128      # lane width
SUB = 8          # sublanes per vreg


def _round_up(x, m):
    return (x + m - 1) // m * m


def _min_row_multiple(*dtypes):
    # sublane granularity per dtype: 8 rows (4B), 16 rows (2B), 32 rows (1B)
    return max(max(8, 32 // jnp.dtype(d).itemsize) for d in dtypes)


def _partial_sumsq_kernel(yhat_ref, y_ref, out_ref, *, tile_r, valid_rows,
                          mask_tail):
    # Upcast in-kernel so HBM traffic stays at the input's native width.
    d = yhat_ref[...].astype(jnp.float32) - y_ref[...].astype(jnp.float32)

    if mask_tail:
        # Zero out rows past the true (unpadded) row count; handles both the
        # last partial block and blocks larger than the array.
        row0 = pl.program_id(0) * tile_r
        rid = row0 + jax.lax.broadcasted_iota(jnp.int32, d.shape, 0)
        d = jnp.where(rid < valid_rows, d, 0.0)

    d2 = d * d
    # Lane-dense partial sum: (tile_r, 128) -> (tile_r/8, 8, 128), reduce the
    # leading axis (pure vreg-wise VPU adds, no XLU cross-lane work).
    psum = d2.reshape(tile_r // SUB, SUB, LANES).sum(axis=0)
    out_ref[...] = psum.reshape(1, SUB, LANES)


def _sumsq_diff(yhat_2d, y_2d, valid_rows):
    rows = yhat_2d.shape[0]
    row_mult = _min_row_multiple(yhat_2d.dtype, y_2d.dtype)
    tile_r = min(TILE_R, _round_up(rows, row_mult))
    num_blocks = pl.cdiv(rows, tile_r)
    mask_tail = (rows % tile_r) != 0

    kernel = functools.partial(
        _partial_sumsq_kernel,
        tile_r=tile_r,
        valid_rows=valid_rows,
        mask_tail=mask_tail,
    )

    partials = pl.pallas_call(
        kernel,
        out_shape=jax.ShapeDtypeStruct((num_blocks, SUB, LANES), jnp.float32),
        grid_spec=pltpu.PrefetchScalarGridSpec(
            num_scalar_prefetch=0,
            grid=(num_blocks,),
            in_specs=[
                pl.BlockSpec((tile_r, LANES), lambda i: (i, 0)),
                pl.BlockSpec((tile_r, LANES), lambda i: (i, 0)),
            ],
            out_specs=pl.BlockSpec((1, SUB, LANES), lambda i: (i, 0, 0)),
        ),
        compiler_params=pltpu.CompilerParams(
            # Independent per-block outputs -> safe to shard the row axis
            # across TensorCores (v7x megacore); harmless on v5e/v6e.
            dimension_semantics=("parallel",),
        ),
    )(yhat_2d, y_2d)

    # Tiny final reduce (num_blocks * 1024 f32) done by XLA.
    return jnp.sum(partials, dtype=jnp.float32)


def rmse_loss(yhat, y, eps=1e-6):
    """RMSELoss.forward equivalent."""
    if yhat.shape != y.shape:
        # PyTorch branch: y.unsqueeze(1), then MSELoss broadcasting.
        y = jnp.expand_dims(y, 1)
    # NOTE: broadcast_to materializes y at yhat's full size only in the
    # shape-mismatch branch (extra HBM traffic there).
    # TODO(synk): express the broadcast via the y BlockSpec index_map instead
    # of materializing, for arbitrary broadcast patterns.
    y = jnp.broadcast_to(y, yhat.shape)

    n = yhat.size  # mean denominator (number of elements of yhat)

    # Flatten in native dtype (no wrapper upcast).  Pad only to a multiple of
    # the 128-lane width; padded positions contribute 0 to the sum.  The row
    # tail is masked inside the kernel instead of padding to a full block.
    yhat_f = yhat.reshape(-1)
    y_f = y.reshape(-1)
    pad = (-n) % LANES
    if pad:
        yhat_f = jnp.pad(yhat_f, (0, pad))
        y_f = jnp.pad(y_f, (0, pad))
    rows = (n + pad) // LANES
    yhat_2d = yhat_f.reshape(rows, LANES)
    y_2d = y_f.reshape(rows, LANES)

    sum_sq = _sumsq_diff(yhat_2d, y_2d, valid_rows=rows)
    return jnp.sqrt(sum_sq / jnp.float32(n) + jnp.float32(eps))


if __name__ == "__main__":
    key = jax.random.PRNGKey(0)
    k1, k2, k3, k4 = jax.random.split(key, 4)
    eps = 1e-6

    # Case 1: equal shapes (e.g. regression outputs B x C x H x W).
    yhat = jax.random.normal(k1, (2, 4, 16, 16), dtype=jnp.float32)
    y = jax.random.normal(k2, (2, 4, 16, 16), dtype=jnp.float32)
    loss1 = jax.block_until_ready(rmse_loss(yhat, y, eps=eps))
    ref1 = jnp.sqrt(jnp.mean((yhat - y) ** 2) + eps)
    assert jnp.allclose(loss1, ref1, rtol=1e-5, atol=1e-6), (loss1, ref1)

    # Case 2: mismatched shapes -> y.unsqueeze(1) branch.
    yhat2 = jax.random.normal(k3, (2, 1, 16, 16), dtype=jnp.float32)
    y2 = jax.random.normal(k4, (2, 16, 16), dtype=jnp.float32)
    loss2 = jax.block_until_ready(rmse_loss(yhat2, y2, eps=eps))
    ref2 = jnp.sqrt(jnp.mean((yhat2 - y2[:, None]) ** 2) + eps)
    assert jnp.allclose(loss2, ref2, rtol=1e-5, atol=1e-6), (loss2, ref2)

    # Case 3: non-multiple-of-128 element count + odd row tail (mask path).
    yhat3 = jax.random.normal(k1, (3, 5, 7, 11), dtype=jnp.float32)
    y3 = jax.random.normal(k2, (3, 5, 7, 11), dtype=jnp.float32)
    loss3 = jax.block_until_ready(rmse_loss(yhat3, y3, eps=eps))
    ref3 = jnp.sqrt(jnp.mean((yhat3 - y3) ** 2) + eps)
    assert jnp.allclose(loss3, ref3, rtol=1e-5, atol=1e-6), (loss3, ref3)

    print("KERNEL_OK")
</pallas_src>

<mosaic_0001>
module attributes {stable_mosaic.version = 11 : i64} {
  func.func @_partial_sumsq_kernel(%arg0: i32, %arg1: memref<16x128xf32, #tpu.memory_space<vmem>>, %arg2: memref<16x128xf32, #tpu.memory_space<vmem>>, %arg3: memref<1x8x128xf32, #tpu.memory_space<vmem>>) attributes {dimension_semantics = [#tpu.dimension_semantics<parallel>], iteration_bounds = array<i64: 1>, scalar_prefetch = 0 : i64, scratch_operands = 0 : i64, tpu.core_type = #tpu.core_type<tc>, window_params = [{transform_indices = @transform_0, window_bounds = array<i64: 16, 128>}, {transform_indices = @transform_1, window_bounds = array<i64: 16, 128>}, {transform_indices = @transform_2, window_bounds = array<i64: 1, 8, 128>}]} {
    %c0 = arith.constant 0 : index
    %c0_0 = arith.constant 0 : index
    %0 = vector.load %arg1[%c0, %c0_0] : memref<16x128xf32, #tpu.memory_space<vmem>>, vector<16x128xf32>
    %c0_1 = arith.constant 0 : index
    %c0_2 = arith.constant 0 : index
    %1 = vector.load %arg2[%c0_1, %c0_2] : memref<16x128xf32, #tpu.memory_space<vmem>>, vector<16x128xf32>
    %2 = arith.subf %0, %1 : vector<16x128xf32>
    %3 = arith.mulf %2, %2 : vector<16x128xf32>
    %4 = vector.shape_cast %3 : vector<16x128xf32> to vector<2x8x128xf32>
    %cst = arith.constant dense<0.000000e+00> : vector<8x128xf32>
    %5 = vector.multi_reduction <add>, %4, %cst [0] : vector<2x8x128xf32> to vector<8x128xf32>
    %6 = vector.shape_cast %5 : vector<8x128xf32> to vector<1x8x128xf32>
    %c0_3 = arith.constant 0 : index
    %c0_4 = arith.constant 0 : index
    %c0_5 = arith.constant 0 : index
    %7 = vector.load %arg3[%c0_3, %c0_4, %c0_5] : memref<1x8x128xf32, #tpu.memory_space<vmem>>, vector<1x8x128xf32>
    tpu.vector_store %arg3[%c0_3, %c0_4, %c0_5], %6 {strides = array<i32>} : memref<1x8x128xf32, #tpu.memory_space<vmem>>, vector<1x8x128xf32>,
    return
  }
  func.func @transform_0(%arg0: i32) -> (i32, i32) {
    %c0_i32 = arith.constant 0 : i32
    %c0_i32_0 = arith.constant 0 : i32
    return %arg0, %c0_i32 : i32, i32
  }
  func.func @transform_1(%arg0: i32) -> (i32, i32) {
    %c0_i32 = arith.constant 0 : i32
    %c0_i32_0 = arith.constant 0 : i32
    return %arg0, %c0_i32 : i32, i32
  }
  func.func @transform_2(%arg0: i32) -> (i32, i32, i32) {
    %c0_i32 = arith.constant 0 : i32
    %c0_i32_0 = arith.constant 0 : i32
    %c0_i32_1 = arith.constant 0 : i32
    return %arg0, %c0_i32, %c0_i32_0 : i32, i32, i32
  }
}

</mosaic_0001>

<bundles_post_ra>
// kernel: tpu_custom_call.1
= control target key start
LH: loop header
LB: loop body
LE: loop exit
PB: predicated region body
PF: predicated region fallthrough
CT: control target
= control target key end

     0   :  { %7 = vsyncpa [#allocation3], 0  ;;  %s166_s0 = inlined_call_operand.hbm [shape: f32[16,128], index: 0, kind: input, shape index: {}]   ;;  %s167_s1 = inlined_call_operand.hbm [shape: f32[16,128], index: 1, kind: input, shape index: {}]   ;;  %s168_s2 = inlined_call_operand.hbm [shape: f32[1,8,128], index: 2, kind: output, shape index: {}]  }
   0x1   :  { %8 = vsyncpa [#allocation6], 0 }
   0x2   :  { %9 = vsyncpa [#allocation4], 0  ;;  %s137_s9 = smov [#allocation2]  }
   0x3   :  { %s15_s10 = sshll.u32 %s137_s9, 4  ;;  %s16_s10 = int_to_ptr.vmem [resolvable:$true] %s15_s10 }
   0x4   :  { %s79_s11 = scalar_lea.vmem %s16_s10, 256  ;;  %p84_p1 = scmp.lt.s32.totalorder %s16_s10, %s16_s10 }
   0x5   :  { %p80_p0 = scmp.ne.s32.totalorder %s16_s10, %s79_s11  ;;  %p85_p2 = scmp.lt.s32.totalorder %s79_s11, %s79_s11 }
   0x7   :  { %p86_p3 = por %p85_p2, %p84_p1 }
   0x9   :  { %p87_p4 = pnand %p86_p3, %p80_p0 }
   0xb   :  { %90 = shalt.err (!%p87_p4)
}
   0xc   :  { %s138_s12 = smov 128   ;;  %s139_s13 = smov 8  }
   0xd   :  { %21 = dma.hbm_to_vmem [thread:$0]  %s166_s0, 256, %s16_s10, [#allocation3], %s138_s12, %s138_s12, %s139_s13  }
   0xe   :  { %s140_s16 = smov [#allocation5]  }
   0xf   :  { %s27_s17 = sshll.u32 %s140_s16, 4  ;;  %s28_s17 = int_to_ptr.vmem [resolvable:$true] %s27_s17 }
  0x10   :  { %s99_s18 = scalar_lea.vmem %s28_s17, 256  ;;  %p104_p6 = scmp.lt.s32.totalorder %s28_s17, %s28_s17 }
  0x11   :  { %p100_p5 = scmp.ne.s32.totalorder %s28_s17, %s99_s18  ;;  %p105_p7 = scmp.lt.s32.totalorder %s99_s18, %s99_s18 }
  0x13   :  { %p106_p8 = por %p105_p7, %p104_p6 }
  0x15   :  { %p107_p9 = pnand %p106_p8, %p100_p5 }
  0x17   :  { %110 = shalt.err (!%p107_p9)
}
  0x18   :  { %33 = dma.hbm_to_vmem [thread:$0]  %s167_s1, 256, %s28_s17, [#allocation6], %s138_s12, %s138_s12, %s139_s13  }
  0x19   :  { %131 = dma.done.wait [#allocation3], 256  }
  0x1a   :  { %132 = vsyncadd [#allocation3], 4294967040 }
  0x1b   :  { %133 = dma.done.wait [#allocation6], 256  }
  0x1c   :  { %134 = vsyncadd [#allocation6], 4294967040  ;;  %v40_v0 = vld [vmem:[#allocation2] sm:$0xff]  ;;  %v41_v1 = vld [vmem:[#allocation2 + $0x8] sm:$0xff]  ;;  %s141_s0 = smov [#allocation7]  }
  0x1d   :  { %v42_v2 = vld [vmem:[#allocation5] sm:$0xff]  ;;  %v43_v3 = vld [vmem:[#allocation5 + $0x8] sm:$0xff]  ;;  %s56_s21 = sshll.u32 %s141_s0, 4  ;;  %s57_s21 = int_to_ptr.vmem [resolvable:$true] %s56_s21 }
  0x1e   :  { %v44_v4 = vsub.f32 %v40_v0, %v42_v2  ;;  %v45_v5 = vsub.f32 %v41_v1, %v43_v3  ;;  %s111_s22 = scalar_lea.vmem %s57_s21, 128  ;;  %p116_p11 = scmp.lt.s32.totalorder %s57_s21, %s57_s21 }
  0x1f   :  { %p112_p10 = scmp.ne.s32.totalorder %s57_s21, %s111_s22  ;;  %p117_p12 = scmp.lt.s32.totalorder %s111_s22, %s111_s22 }
  0x20   :  { %v46_v6 = vmul.f32 %v44_v4, %v44_v4  ;;  %v47_v7 = vmul.f32 %v45_v5, %v45_v5 }
  0x21   :  { %p118_p13 = por %p117_p12, %p116_p11 }
  0x22   :  { %v48_v8 = vadd.f32 %v47_v7, %v46_v6 }
  0x23   :  { %p119_p0 = pnand %p118_p13, %p112_p10 }
  0x24   :  { %49 = vst [vmem:[#allocation7] sm:$0xff] %v48_v8 }
  0x25   :  { %122 = shalt.err (!%p119_p0)
}
  0x26   :  { %59 = dma.vmem_to_hbm [thread:$0]  %s57_s21, 128, %s168_s2, [#allocation4]  }
  0x27   :  { %135 = dma.done.wait [#allocation4], 128  }
  0x28   :  { %136 = vsyncadd [#allocation4], 4294967168 }
  0x29   :  { %63 = vsyncpa [#allocation3], 1 }
  0x2a   :  { %64 = vsyncpa [#allocation6], 1 }
  0x2b   :  { %65 = vsyncpa [#allocation4], 1 }

</bundles_post_ra>
